<compile_context>
chip_gen: v6e
topology: v6e:2x2x1
jax: 0.10.0
libtpu: 0.0.40
codegen_flags: <defaults>
</compile_context>

<pallas_src>
import jax
import jax.numpy as jnp
from jax.experimental import pallas as pl
from jax.experimental.pallas import tpu as pltpu


def _round_up(x, m):
    return ((x + m - 1) // m) * m


def _vmem_limit_bytes():
    # ~100 MiB on 128-MiB-VMEM chips (v5e/v6e), ~48 MiB on v7x (64 MiB/TC); safe fallback.
    cap = 64 * 1024 * 1024
    try:
        cap = int(pltpu.get_tpu_info().vmem_capacity_bytes)
    except Exception:
        pass
    return int(min(max(cap - (16 << 20), 32 << 20), 100 << 20))


def _balance_perm(num_experts):
    # interleave shallow/deep experts so a contiguous megacore split over E is balanced (v7x)
    lo, hi, perm = 0, num_experts - 1, []
    while lo <= hi:
        perm.append(lo)
        lo += 1
        if lo <= hi:
            perm.append(hi)
            hi -= 1
    return perm


# ----------------------- gating + shared-prologue kernel -------------------- #
def gating_kernel(x_ref, adj_ref, seg_ref, inv_ref, wg_ref, logits_ref, agg0_ref):
    i = pl.program_id(0)
    tile_n = adj_ref.shape[0]
    x = x_ref[...]                                            # [N_pad, D_pad] bf16 (resident)

    @pl.when(i == 0)
    def _():
        # global_mean_pool first, then the linear gate (equivalent because the gate is linear)
        xpool = jnp.dot(seg_ref[...], x, preferred_element_type=jnp.float32) * inv_ref[...]
        logits_ref[...] = jnp.dot(xpool, wg_ref[...], preferred_element_type=jnp.float32)

    # Shared first GIN aggregation (train_eps=False -> eps=0): agg0 = x + adj @ x
    # TODO(synk): OGB GINConv messages are relu(x_j + bond_emb); edge features not injected.
    start = pl.multiple_of(i * tile_n, tile_n)
    x_tile = x_ref[pl.ds(start, tile_n), :].astype(jnp.float32)
    agg = x_tile + jnp.dot(adj_ref[...], x, preferred_element_type=jnp.float32)
    agg0_ref[...] = agg.astype(jnp.bfloat16)


def gate_and_prologue(x_bf, adj_bf, seg_bf, inv_counts, w_gate, tile_n):
    N_pad, D_pad = x_bf.shape
    B = seg_bf.shape[0]
    E = w_gate.shape[1]
    n_tiles = N_pad // tile_n

    def invariant(shape):
        return pl.BlockSpec(shape, lambda i: tuple(0 for _ in shape),
                            pipeline_mode=pl.Buffered(buffer_count=1))

    flops = 2 * N_pad * N_pad * D_pad + 2 * B * N_pad * D_pad + 2 * B * D_pad * E
    bytes_accessed = (2 * N_pad * N_pad + 4 * N_pad * D_pad + 2 * B * N_pad
                      + 4 * D_pad * E + 4 * B * (E + 1))

    return pl.pallas_call(
        gating_kernel,
        out_shape=(jax.ShapeDtypeStruct((B, E), jnp.float32),
                   jax.ShapeDtypeStruct((N_pad, D_pad), jnp.bfloat16)),
        grid=(n_tiles,),
        in_specs=[
            invariant((N_pad, D_pad)),                        # x   (full, single-buffered)
            pl.BlockSpec((tile_n, N_pad), lambda i: (i, 0)),  # adj row tile (pipelined DMA)
            invariant((B, N_pad)),                            # seg
            invariant((B, 1)),                                # inv
            invariant((D_pad, E)),                            # w_gate
        ],
        out_specs=(
            pl.BlockSpec((B, E), lambda i: (0, 0)),           # logits (written at tile 0)
            pl.BlockSpec((tile_n, D_pad), lambda i: (i, 0)),  # agg0 row tile
        ),
        compiler_params=pltpu.CompilerParams(
            dimension_semantics=("arbitrary",),
            vmem_limit_bytes=_vmem_limit_bytes()),
        cost_estimate=pl.CostEstimate(flops=flops, transcendentals=0,
                                      bytes_accessed=bytes_accessed),
    )(x_bf, adj_bf, seg_bf, inv_counts, w_gate)


# ------------------------- fused per-expert kernel -------------------------- #
def fused_expert_kernel(nl_ref, agg0_ref, adj_ref, seg_ref, inv_ref,
                        w1_ref, b1_ref, w2_ref, b2_ref, out_ref, h_scr):
    e = pl.program_id(0)
    l = pl.program_id(1)
    nl = nl_ref[e]                                            # this expert's layer count (>= 2)

    def mlp(agg_bf):
        # Linear(D,2D) -> BatchNorm (identity at default eval stats) -> ReLU -> Linear(2D,D)
        z = jnp.dot(agg_bf, w1_ref[...], preferred_element_type=jnp.float32) + b1_ref[...]
        z = jnp.maximum(z, 0.0)
        return jnp.dot(z.astype(jnp.bfloat16), w2_ref[...],
                       preferred_element_type=jnp.float32) + b2_ref[...]

    @pl.when(l == 0)
    def _():
        # layer 0 consumes the shared aggregation; never the last layer (nl >= 2) -> ReLU
        # (dropout = identity in eval)
        h_scr[...] = jnp.maximum(mlp(agg0_ref[...]), 0.0)

    @pl.when(jnp.logical_and(l >= 1, l < nl))
    def _():
        h = h_scr[...]                                        # f32 [N_pad, D_pad]
        agg = h + jnp.dot(adj_ref[...], h.astype(jnp.bfloat16),
                          preferred_element_type=jnp.float32)
        z = mlp(agg.astype(jnp.bfloat16))
        # ReLU on all but this expert's last layer (JK='last'); dropout = identity in eval
        h_scr[...] = jnp.where(l < nl - 1, jnp.maximum(z, 0.0), z)

    @pl.when(l == pl.num_programs(1) - 1)
    def _():
        # global_mean_pool epilogue
        out_ref[...] = jnp.dot(seg_ref[...], h_scr[...].astype(jnp.bfloat16),
                               preferred_element_type=jnp.float32) * inv_ref[...]


def run_experts(agg0, adj_bf, seg_bf, inv_counts, w1, b1, w2, b2, n_layers):
    E, L_max, D_pad, H_pad = w1.shape
    N_pad = agg0.shape[0]
    B = seg_bf.shape[0]

    def invariant(shape):
        return pl.BlockSpec(shape, lambda e, l, nl: tuple(0 for _ in shape),
                            pipeline_mode=pl.Buffered(buffer_count=1))

    def wmap(e, l, nl):
        # clamp padded layers to the expert's last real layer -> repeated block index,
        # so their weights are not re-fetched (compute for those layers is pl.when-skipped)
        return (e, jnp.minimum(l, nl[e] - 1), 0, 0)

    try:
        total_layers = int(jnp.sum(n_layers))
    except Exception:                                         # traced under jit -> upper bound
        total_layers = E * L_max
    flops = (total_layers * 4 * N_pad * D_pad * H_pad
             + (total_layers - E) * 2 * N_pad * N_pad * D_pad
             + E * 2 * B * N_pad * D_pad)
    bytes_accessed = (2 * N_pad * N_pad + 2 * N_pad * D_pad + 2 * B * N_pad
                      + total_layers * (4 * D_pad * H_pad + 4 * (H_pad + D_pad))
                      + E * 4 * B * D_pad)

    grid_spec = pltpu.PrefetchScalarGridSpec(
        num_scalar_prefetch=1,                                # n_layers -> SMEM
        grid=(E, L_max),
        in_specs=[
            invariant((N_pad, D_pad)),                        # agg0 (shared, single-buffered)
            # TODO(synk): stream adj row tiles from HBM for large N (v7x 64 MiB VMEM)
            invariant((N_pad, N_pad)),                        # adj  (shared, single-buffered)
            invariant((B, N_pad)),                            # seg
            invariant((B, 1)),                                # inv
            pl.BlockSpec((None, None, D_pad, H_pad), wmap),   # w1[e, l] (one layer at a time)
            pl.BlockSpec((None, None, 1, H_pad), wmap),       # b1[e, l]
            pl.BlockSpec((None, None, H_pad, D_pad), wmap),   # w2[e, l]
            pl.BlockSpec((None, None, 1, D_pad), wmap),       # b2[e, l]
        ],
        out_specs=pl.BlockSpec((None, B, D_pad), lambda e, l, nl: (e, 0, 0)),
        scratch_shapes=[pltpu.VMEM((N_pad, D_pad), jnp.float32)],
    )
    return pl.pallas_call(
        fused_expert_kernel,
        out_shape=jax.ShapeDtypeStruct((E, B, D_pad), jnp.float32),
        grid_spec=grid_spec,
        compiler_params=pltpu.CompilerParams(
            dimension_semantics=("parallel", "arbitrary"),    # experts split across TCs (v7x)
            vmem_limit_bytes=_vmem_limit_bytes()),
        cost_estimate=pl.CostEstimate(flops=flops, transcendentals=0,
                                      bytes_accessed=bytes_accessed),
    )(n_layers, agg0, adj_bf, seg_bf, inv_counts, w1, b1, w2, b2)


# ------------------------------- JAX glue ----------------------------------- #
def cv_squared(x):
    eps = 1e-10
    x = x.astype(jnp.float32)
    if x.shape[0] == 1:
        return jnp.zeros((), jnp.float32)
    return jnp.var(x, ddof=1) / (jnp.mean(x) ** 2 + eps)      # torch .var() is unbiased


def init_params(key, D, E, min_layers, f_atom=3, f_bond=3, vocab=10):
    L_max = min_layers + E - 1
    H = 2 * D
    keys = jax.random.split(key, 4)
    params = {
        # embedding tables: one per categorical feature column, summed (AtomEncoder / BondEncoder)
        "atom_emb": jax.random.normal(keys[0], (f_atom, vocab, D), jnp.float32) * 0.1,
        "bond_emb": jax.random.normal(keys[1], (f_bond, vocab, D), jnp.float32) * 0.1,
        # module __init__ uses zeros; small deterministic values so top-k is non-trivial
        "w_gate": jax.random.normal(keys[2], (D, E), jnp.float32) * 0.1,
        "w_noise": jnp.zeros((D, E), jnp.float32),
        "expert_layers": jnp.arange(min_layers, min_layers + E, dtype=jnp.int32),
    }
    # expert weights padded to L_max layers (padded layers are skipped in-kernel)
    w1 = jnp.zeros((E, L_max, D, H), jnp.float32)
    w2 = jnp.zeros((E, L_max, H, D), jnp.float32)
    ek = jax.random.split(keys[3], E)
    for i in range(E):
        L = min_layers + i                                    # expert i has (min_layers + i) layers
        k1, k2 = jax.random.split(ek[i])
        w1 = w1.at[i, :L].set(jax.random.normal(k1, (L, D, H), jnp.float32) / jnp.sqrt(D))
        w2 = w2.at[i, :L].set(jax.random.normal(k2, (L, H, D), jnp.float32) / jnp.sqrt(H))
    params["expert_w1"] = w1
    params["expert_b1"] = jnp.zeros((E, L_max, 1, H), jnp.float32)
    params["expert_w2"] = w2
    params["expert_b2"] = jnp.zeros((E, L_max, 1, D), jnp.float32)
    return params


def moe_ogb_forward(params, x_cat, edge_index, edge_attr_cat, batch,
                    num_graphs, k, loss_coef):
    N = x_cat.shape[0]
    D = params["atom_emb"].shape[-1]
    E = params["w_gate"].shape[1]
    L_max = params["expert_w1"].shape[1]
    H = params["expert_w1"].shape[-1]

    # lane-dense padding (padded channels are exactly zero -> real channels unchanged)
    D_pad = _round_up(D, 128)
    H_pad = _round_up(H, 128)
    TILE = 256
    if N <= TILE:
        N_pad = _round_up(N, 16)
        tile_n = N_pad
    else:
        N_pad = _round_up(N, TILE)
        tile_n = TILE

    # atom encoder -- embedding-lookup glue
    x_emb = jnp.zeros((N, D), jnp.float32)
    for f in range(x_cat.shape[1]):
        x_emb = x_emb + params["atom_emb"][f][x_cat[:, f]]
    # bond encoder (computed for parity; unused by the linear gate / GIN approximation)
    # TODO(synk): bond embeddings are not injected into the GIN messages.
    e_emb = jnp.zeros((edge_attr_cat.shape[0], D), jnp.float32)
    for f in range(edge_attr_cat.shape[1]):
        e_emb = e_emb + params["bond_emb"][f][edge_attr_cat[:, f]]

    # dense graph structure; adj/seg hold small integer counts so bf16 is exact.
    x_bf = jnp.zeros((N_pad, D_pad), jnp.bfloat16).at[:N, :D].set(x_emb.astype(jnp.bfloat16))
    seg_f32 = (batch[None, :] == jnp.arange(num_graphs)[:, None]).astype(jnp.float32)   # [B, N]
    inv_counts = 1.0 / seg_f32.sum(axis=1, keepdims=True)                               # [B, 1]
    seg_bf = jnp.zeros((num_graphs, N_pad), jnp.bfloat16).at[:, :N].set(
        seg_f32.astype(jnp.bfloat16))
    # incoming-edge orientation adj[dst, src] with multiplicity (matches PyG scatter-add)
    adj_bf = (jnp.zeros((N_pad, N_pad), jnp.float32)
              .at[edge_index[1], edge_index[0]].add(1.0)).astype(jnp.bfloat16)
    w_gate_p = jnp.zeros((D_pad, E), jnp.float32).at[:D, :].set(params["w_gate"])

    # ---- noisy_top_k_gating (eval path: no noise) + shared layer-0 aggregation ----
    # TODO(synk): noisy-gating training branch (_prob_in_top_k, randn noise) not implemented.
    logits, agg0 = gate_and_prologue(x_bf, adj_bf, seg_bf, inv_counts, w_gate_p, tile_n)
    B = num_graphs
    top_logits, top_idx = jax.lax.top_k(logits, min(k + 1, E))
    top_k_gates = jax.nn.softmax(top_logits[:, :k], axis=1)
    gates = jnp.zeros_like(logits).at[jnp.arange(B)[:, None], top_idx[:, :k]].set(top_k_gates)
    load = (gates > 0).sum(axis=0)
    importance = gates.sum(axis=0)
    loss = (cv_squared(importance) + cv_squared(load)) * loss_coef

    # ---- pad expert weights lane-dense (zeros keep real channels exact) ----
    # TODO(synk): BatchNorm treated as identity (default eval running stats); fold trained
    #             stats/affine params into w1/b1 for real checkpoints.
    w1 = jnp.zeros((E, L_max, D_pad, H_pad), jnp.float32).at[:, :, :D, :H].set(params["expert_w1"])
    b1 = jnp.zeros((E, L_max, 1, H_pad), jnp.float32).at[:, :, :, :H].set(params["expert_b1"])
    w2 = jnp.zeros((E, L_max, H_pad, D_pad), jnp.float32).at[:, :, :H, :D].set(params["expert_w2"])
    b2 = jnp.zeros((E, L_max, 1, D_pad), jnp.float32).at[:, :, :, :D].set(params["expert_b2"])

    # interleave shallow/deep experts so the megacore split over E is balanced (v7x)
    perm = jnp.asarray(_balance_perm(E), jnp.int32)
    expert_pooled = run_experts(
        agg0, adj_bf, seg_bf, inv_counts,
        w1[perm].astype(jnp.bfloat16), b1[perm],
        w2[perm].astype(jnp.bfloat16), b2[perm],
        params["expert_layers"][perm])                        # [E, B, D_pad] (perm order)

    # ---- mixture combine: y = (gates.unsqueeze(-1) * expert_outputs).sum(dim=1) ----
    y = jnp.einsum("be,ebd->bd", gates[:, perm], expert_pooled)[:, :D]
    return y, loss


if __name__ == "__main__":
    key = jax.random.PRNGKey(0)
    D, E, k, min_layers = 32, 4, 2, 2       # input_size, num_experts, top-k, min_layers
    N, B = 32, 2                            # total nodes, graphs in the batch
    loss_coef = 0.001

    kp, kx, ke, k0, k1 = jax.random.split(key, 5)
    params = init_params(kp, D, E, min_layers)

    # categorical node / edge features (OGB-style, 3 feature columns, vocab 10)
    x_cat = jax.random.randint(kx, (N, 3), 0, 10)
    n_e0, n_e1 = 40, 24
    edge_attr_cat = jax.random.randint(ke, (n_e0 + n_e1, 3), 0, 10)
    # edges stay within their own graph: graph 0 owns nodes [0, 20), graph 1 owns [20, 32)
    e0 = jax.random.randint(k0, (2, n_e0), 0, 20)
    e1 = jax.random.randint(k1, (2, n_e1), 20, N)
    edge_index = jnp.concatenate([e0, e1], axis=1)
    batch = jnp.concatenate([jnp.zeros(20, jnp.int32), jnp.ones(N - 20, jnp.int32)])

    y, loss = moe_ogb_forward(params, x_cat, edge_index, edge_attr_cat,
                              batch, B, k, loss_coef)
    jax.block_until_ready((y, loss))
    assert y.shape == (B, D) and loss.shape == ()
    print("KERNEL_OK")
</pallas_src>

<mosaic_0001>
module attributes {stable_mosaic.version = 11 : i64} {
  func.func @gating_kernel(%arg0: i32, %arg1: memref<32x128xbf16, #tpu.memory_space<vmem>>, %arg2: memref<32x32xbf16, #tpu.memory_space<vmem>>, %arg3: memref<2x32xbf16, #tpu.memory_space<vmem>>, %arg4: memref<2x1xf32, #tpu.memory_space<vmem>>, %arg5: memref<128x4xf32, #tpu.memory_space<vmem>>, %arg6: memref<2x4xf32, #tpu.memory_space<vmem>>, %arg7: memref<32x128xbf16, #tpu.memory_space<vmem>>) attributes {dimension_semantics = [#tpu.dimension_semantics<arbitrary>], iteration_bounds = array<i64: 1>, scalar_prefetch = 0 : i64, scratch_operands = 0 : i64, tpu.core_type = #tpu.core_type<tc>, window_params = [{pipeline_mode = #tpu.pipeline_mode<synchronous>, transform_indices = @transform_0, window_bounds = array<i64: 32, 128>}, {transform_indices = @transform_1, window_bounds = array<i64: 32, 32>}, {pipeline_mode = #tpu.pipeline_mode<synchronous>, transform_indices = @transform_2, window_bounds = array<i64: 2, 32>}, {pipeline_mode = #tpu.pipeline_mode<synchronous>, transform_indices = @transform_3, window_bounds = array<i64: 2, 1>}, {pipeline_mode = #tpu.pipeline_mode<synchronous>, transform_indices = @transform_4, window_bounds = array<i64: 128, 4>}, {pipeline_mode = #tpu.pipeline_mode<synchronous>, transform_indices = @transform_5, window_bounds = array<i64: 2, 4>}, {transform_indices = @transform_6, window_bounds = array<i64: 32, 128>}]} {
    %c0 = arith.constant 0 : index
    %c0_0 = arith.constant 0 : index
    %0 = vector.load %arg1[%c0, %c0_0] : memref<32x128xbf16, #tpu.memory_space<vmem>>, vector<32x128xbf16>
    %c0_i32 = arith.constant 0 : i32
    %1 = arith.cmpi eq, %arg0, %c0_i32 : i32
    %2 = arith.extui %1 : i1 to i32
    %c0_i32_1 = arith.constant 0 : i32
    %3 = arith.cmpi ne, %2, %c0_i32_1 : i32
    scf.if %3 {
      %c0_7 = arith.constant 0 : index
      %c0_8 = arith.constant 0 : index
      %14 = vector.load %arg3[%c0_7, %c0_8] : memref<2x32xbf16, #tpu.memory_space<vmem>>, vector<2x32xbf16>
      %cst_9 = arith.constant dense<0.000000e+00> : vector<2x128xf32>
      %15 = tpu.matmul %14, %0, %cst_9 {dimension_numbers = #tpu.dot_dimension_numbers<[1], [0], [0], [1], [0, 0, 1, 1], [], []>} : vector<2x32xbf16>, vector<32x128xbf16>, vector<2x128xf32> -> vector<2x128xf32>
      %c0_10 = arith.constant 0 : index
      %c0_11 = arith.constant 0 : index
      %16 = vector.load %arg4[%c0_10, %c0_11] : memref<2x1xf32, #tpu.memory_space<vmem>>, vector<2x1xf32>
      %17 = vector.broadcast %16 : vector<2x1xf32> to vector<2x128xf32>
      %18 = arith.mulf %15, %17 : vector<2x128xf32>
      %c0_12 = arith.constant 0 : index
      %c0_13 = arith.constant 0 : index
      %19 = vector.load %arg5[%c0_12, %c0_13] : memref<128x4xf32, #tpu.memory_space<vmem>>, vector<128x4xf32>
      %cst_14 = arith.constant dense<0.000000e+00> : vector<2x4xf32>
      %20 = tpu.matmul %18, %19, %cst_14 {dimension_numbers = #tpu.dot_dimension_numbers<[1], [0], [0], [1], [0, 0, 1, 1], [], []>} : vector<2x128xf32>, vector<128x4xf32>, vector<2x4xf32> -> vector<2x4xf32>
      %c0_15 = arith.constant 0 : index
      %c0_16 = arith.constant 0 : index
      %21 = vector.load %arg6[%c0_15, %c0_16] : memref<2x4xf32, #tpu.memory_space<vmem>>, vector<2x4xf32>
      tpu.vector_store %arg6[%c0_15, %c0_16], %20 {strides = array<i32>} : memref<2x4xf32, #tpu.memory_space<vmem>>, vector<2x4xf32>,
    } else {
    }
    %c32_i32 = arith.constant 32 : i32
    %4 = arith.muli %arg0, %c32_i32 : i32
    %5 = tpu.assume_multiple %4, 32 : i32
    %6 = arith.index_cast %5 : i32 to index
    %c0_2 = arith.constant 0 : index
    %7 = vector.load %arg1[%6, %c0_2] : memref<32x128xbf16, #tpu.memory_space<vmem>>, vector<32x128xbf16>
    %8 = arith.extf %7 : vector<32x128xbf16> to vector<32x128xf32>
    %c0_3 = arith.constant 0 : index
    %c0_4 = arith.constant 0 : index
    %9 = vector.load %arg2[%c0_3, %c0_4] : memref<32x32xbf16, #tpu.memory_space<vmem>>, vector<32x32xbf16>
    %cst = arith.constant dense<0.000000e+00> : vector<32x128xf32>
    %10 = tpu.matmul %9, %0, %cst {dimension_numbers = #tpu.dot_dimension_numbers<[1], [0], [0], [1], [0, 0, 1, 1], [], []>} : vector<32x32xbf16>, vector<32x128xbf16>, vector<32x128xf32> -> vector<32x128xf32>
    %11 = arith.addf %8, %10 : vector<32x128xf32>
    %12 = arith.truncf %11 : vector<32x128xf32> to vector<32x128xbf16>
    %c0_5 = arith.constant 0 : index
    %c0_6 = arith.constant 0 : index
    %13 = vector.load %arg7[%c0_5, %c0_6] : memref<32x128xbf16, #tpu.memory_space<vmem>>, vector<32x128xbf16>
    tpu.vector_store %arg7[%c0_5, %c0_6], %12 {strides = array<i32>} : memref<32x128xbf16, #tpu.memory_space<vmem>>, vector<32x128xbf16>,
    return
  }
  func.func @transform_0(%arg0: i32) -> (i32, i32) {
    %c0_i32 = arith.constant 0 : i32
    %c0_i32_0 = arith.constant 0 : i32
    %c0_i32_1 = arith.constant 0 : i32
    return %c0_i32, %c0_i32_0 : i32, i32
  }
  func.func @transform_1(%arg0: i32) -> (i32, i32) {
    %c0_i32 = arith.constant 0 : i32
    %c0_i32_0 = arith.constant 0 : i32
    return %arg0, %c0_i32 : i32, i32
  }
  func.func @transform_2(%arg0: i32) -> (i32, i32) {
    %c0_i32 = arith.constant 0 : i32
    %c0_i32_0 = arith.constant 0 : i32
    %c0_i32_1 = arith.constant 0 : i32
    return %c0_i32, %c0_i32_0 : i32, i32
  }
  func.func @transform_3(%arg0: i32) -> (i32, i32) {
    %c0_i32 = arith.constant 0 : i32
    %c0_i32_0 = arith.constant 0 : i32
    %c0_i32_1 = arith.constant 0 : i32
    return %c0_i32, %c0_i32_0 : i32, i32
  }
  func.func @transform_4(%arg0: i32) -> (i32, i32) {
    %c0_i32 = arith.constant 0 : i32
    %c0_i32_0 = arith.constant 0 : i32
    %c0_i32_1 = arith.constant 0 : i32
    return %c0_i32, %c0_i32_0 : i32, i32
  }
  func.func @transform_5(%arg0: i32) -> (i32, i32) {
    %c0_i32 = arith.constant 0 : i32
    %c0_i32_0 = arith.constant 0 : i32
    %c0_i32_1 = arith.constant 0 : i32
    return %c0_i32, %c0_i32_0 : i32, i32
  }
  func.func @transform_6(%arg0: i32) -> (i32, i32) {
    %c0_i32 = arith.constant 0 : i32
    %c0_i32_0 = arith.constant 0 : i32
    return %arg0, %c0_i32 : i32, i32
  }
}

</mosaic_0001>

<bundles_post_ra>
// kernel: tpu_custom_call.1
= control target key start
LH: loop header
LB: loop body
LE: loop exit
PB: predicated region body
PF: predicated region fallthrough
CT: control target
= control target key end

     0   :  { %12 = vsyncpa [#allocation3], 0  ;;  %v504_v1 = vmov 0.0   ;;  %vm505_vm0 = vmmov 0   ;;  %v506_v4 = vmov 0   ;;  %vm46_vm1 = vcmask 261120   ;;  %s647_s0 = inlined_call_operand.vmem [shape: bf16[32,128], index: 0, kind: input, shape index: {}]   ;;  %s648_s1 = inlined_call_operand.vmem [shape: bf16[32,32], index: 1, kind: input, shape index: {}]   ;;  %s649_s2 = inlined_call_operand.vmem [shape: bf16[2,32], index: 2, kind: input, shape index: {}]   ;;  %s650_s3 = inlined_call_operand.vmem [shape: f32[2,1], index: 3, kind: input, shape index: {}]   ;;  %s651_s4 = inlined_call_operand.vmem [shape: f32[128,4], index: 4, kind: input, shape index: {}]   ;;  %s652_s5 = inlined_call_operand.hbm [shape: f32[2,4], index: 5, kind: output, shape index: {0}]   ;;  %s653_s6 = inlined_call_operand.hbm [shape: bf16[32,128], index: 6, kind: output, shape index: {1}]  }
   0x1   :  { %v456_v0 = vld [vmem:[%s647_s0 + $0x8] sm:$0xff]   ;;  %397 = vmatprep.subr.bf16.mxu0 %v504_v1  ;;  %405 = vmatprep.subr.mxu1 %v504_v1  ;;  %v457_v2 = vld [vmem:[%s647_s0] sm:$0xff]   ;;  %v112_v5 = vld [vmem:[%s651_s4 + $0x78] sm:$0xff] }
   0x2   :  { %398 = vmatpush3.bf16.msra.mxu0 %v456_v0  ;;  %401 = vmatprep.mubr.msk.bf16.mxu0 %vm505_vm0, %v504_v1  ;;  %v90_v3 = vld [vmem:[%s650_s3] sm:$0x3]  ;;  %v111_v6 = vld [vmem:[%s651_s4 + $0x70] sm:$0xff]  ;;  %v110_v8 = vld [vmem:[%s651_s4 + $0x68] sm:$0xff] }
   0x3   :  { %399 = vmatprep.subr.bf16.mxu0 %v504_v1  ;;  %455 = vset.pattern.permute.xlu0 %v506_v4  ;;  %v33_v7 = vld [vmem:[%s649_s2] sm:$0x1]  ;;  %v108_v11 = vld [vmem:[%s651_s4 + $0x58] sm:$0xff] }
   0x4   :  { %93 = vperm.xlu0 %455, %v90_v3   ;;  %406 = vmatpush3.msra.mxu1 %v112_v5  ;;  %v109_v9 = vld [vmem:[%s651_s4 + $0x60] sm:$0xff] }
   0x5   :  { %407 = vmatprep.subr.mxu1 %v504_v1  ;;  %437 = vmatprep.mubr.msk.f32.mxu1 %vm505_vm0, %v504_v1  ;;  %v458_v10 = vld [vmem:[%s648_s1] sm:$0xff]  }
   0x6   :  { %400 = vmatpush3.bf16.msra.mxu0 %v457_v2  ;;  %408 = vmatpush3.msra.mxu1 %v111_v6 }
   0x7   :  { %409 = vmatprep.subr.mxu1 %v504_v1  ;;  %440 = vmatprep.subr.bf16.mxu0 %v456_v0 }
   0x8   :  { %410 = vmatpush3.msra.mxu1 %v110_v8 }
   0x9   :  { %402 = vmatmul.mubr.msk.bf16.vlgmr.msra.gmra.mxu0 %vm46_vm1, %v33_v7  ;;  %411 = vmatprep.subr.mxu1 %v504_v1 }
   0xa   :  { %13 = vsyncpa [#allocation5], 0  ;;  %412 = vmatpush3.msra.mxu1 %v109_v9  ;;  %441 = vmatpush3.bf16.msra.mxu0 %v456_v0  ;;  %v107_v12 = vld [vmem:[%s651_s4 + $0x50] sm:$0xff]  ;;  %v106_v13 = vld [vmem:[%s651_s4 + $0x48] sm:$0xff] }
   0xb   :  { %413 = vmatprep.subr.mxu1 %v504_v1  ;;  %442 = vmatprep.subr.bf16.mxu0 %v457_v2  ;;  %v459_v14 = vld [vmem:[%s648_s1 + $0x8] sm:$0xff]   ;;  %v105_v15 = vld [vmem:[%s651_s4 + $0x40] sm:$0xff]  ;;  %v104_v16 = vld [vmem:[%s651_s4 + $0x38] sm:$0xff] }
   0xc   :  { %414 = vmatpush3.msra.mxu1 %v108_v11  ;;  %444 = vmatprep.mubr.msk.bf16.mxu0 %vm46_vm1, %v458_v10  ;;  %v103_v17 = vld [vmem:[%s651_s4 + $0x30] sm:$0xff]  ;;  %v102_v18 = vld [vmem:[%s651_s4 + $0x28] sm:$0xff]  ;;  %v101_v19 = vld [vmem:[%s651_s4 + $0x20] sm:$0xff] }
   0xd   :  { %415 = vmatprep.subr.mxu1 %v504_v1  ;;  %v100_v20 = vld [vmem:[%s651_s4 + $0x18] sm:$0xff]  ;;  %v99_v21 = vld [vmem:[%s651_s4 + $0x10] sm:$0xff]  ;;  %v98_v22 = vld [vmem:[%s651_s4 + $0x8] sm:$0xff] }
   0xe   :  { %416 = vmatpush3.msra.mxu1 %v107_v12  ;;  %443 = vmatpush3.bf16.msra.mxu0 %v457_v2  ;;  %v97_v23 = vld [vmem:[%s651_s4] sm:$0xff]  ;;  %v371_v29 = vld [vmem:[%s647_s0 + $0x8] sm:$0xff]   ;;  %s507_s4 = smov [#allocation4]  }
   0xf   :  { %417 = vmatprep.subr.mxu1 %v504_v1  ;;  %v354_v31 = vld [vmem:[%s647_s0] sm:$0xff]   ;;  %v359_v32 = vunpack.c.l.bf16 %v371_v29  ;;  %v360_v35 = vunpack.c.h.bf16 %v371_v29  ;;  %s319_s16 = sshll.u32 %s507_s4, 4  ;;  %s320_s16 = int_to_ptr.vmem [resolvable:$true] %s319_s16 }
  0x10   :  { %418 = vmatpush3.msra.mxu1 %v106_v13  ;;  %v355_v34 = vunpack.c.l.bf16 %v354_v31  ;;  %v356_v38 = vunpack.c.h.bf16 %v354_v31  ;;  %s460_s0 = scalar_lea.vmem %s320_s16, 256  ;;  %p465_p1 = scmp.lt.s32.totalorder %s320_s16, %s320_s16 }
  0x11   :  { %419 = vmatprep.subr.mxu1 %v504_v1  ;;  %445 = vmatmul.mubr.msk.bf16.vlgmr.msra.gmra.mxu0 %vm46_vm1, %v459_v14  ;;  %p461_p0 = scmp.ne.s32.totalorder %s320_s16, %s460_s0  ;;  %p466_p2 = scmp.lt.s32.totalorder %s460_s0, %s460_s0 }
  0x12   :  { %420 = vmatpush3.msra.mxu1 %v105_v15 }
  0x13   :  { %421 = vmatprep.subr.mxu1 %v504_v1  ;;  %p467_p3 = por %p466_p2, %p465_p1 }
  0x14   :  { %422 = vmatpush3.msra.mxu1 %v104_v16 }
  0x15   :  { %423 = vmatprep.subr.mxu1 %v504_v1  ;;  %p468_p4 = pnand %p467_p3, %p461_p0 }
  0x16   :  { %424 = vmatpush3.msra.mxu1 %v103_v17 }
  0x17   :  { %425 = vmatprep.subr.mxu1 %v504_v1 }
  0x18   :  { %426 = vmatpush3.msra.mxu1 %v102_v18 }
  0x19   :  { %427 = vmatprep.subr.mxu1 %v504_v1 }
  0x1a   :  { %428 = vmatpush3.msra.mxu1 %v101_v19 }
  0x1b   :  { %429 = vmatprep.subr.mxu1 %v504_v1 }
  0x1c   :  { %430 = vmatpush3.msra.mxu1 %v100_v20 }
  0x1d   :  { %431 = vmatprep.subr.mxu1 %v504_v1 }
  0x1e   :  { %432 = vmatpush3.msra.mxu1 %v99_v21 }
  0x1f   :  { %433 = vmatprep.subr.mxu1 %v504_v1 }
  0x20   :  { %434 = vmatpush3.msra.mxu1 %v98_v22 }
  0x21   :  { %435 = vmatprep.subr.mxu1 %v504_v1 }
  0x22   :  { %436 = vmatpush3.msra.mxu1 %v97_v23 }
  0x7f   :  { %v94_v24 = vpop.permute.xlu0 %93 }
  0xc9   :  { %v84_v25 = vpop.f32.mrf.mxu0 }
  0xca   :  { %v96_v26 = vmul.f32 %v94_v24, %v84_v25 }
  0xcb   :  { %v403_v27 = vpop.f32.mrf.mxu0 }
  0xcc   :  { %438 = vmatmul.mubr.f32.vlgmr.msra.gmra.mxu1 %v96_v26 }
  0xcd   :  { %v87_v28 = vpop.f32.mrf.mxu0 }
  0xcf   :  { %v404_v30 = vpop.f32.mrf.mxu0 }
  0xd1   :  { %v446_v33 = vpop.f32.mrf.mxu0 }
  0xd2   :  { %v282_v37 = vadd.f32 %v446_v33, %v359_v32 }
  0xd3   :  { %v265_v36 = vpop.f32.mrf.mxu0 }
  0xd4   :  { %v280_v40 = vadd.f32 %v355_v34, %v265_v36 }
  0xd5   :  { %v447_v39 = vpop.f32.mrf.mxu0 }
  0xd6   :  { %v283_v41 = vadd.f32 %v447_v39, %v360_v35 }
  0xd7   :  { %v268_v42 = vpop.f32.mrf.mxu0 }
  0xd8   :  { %v369_v43 = vpack.c.bf16 %v283_v41, %v282_v37  ;;  %v281_v44 = vadd.f32 %v356_v38, %v268_v42 }
  0xda   :  { %372 = vst [vmem:[#allocation4 + $0x8] sm:$0xff] %v369_v43   ;;  %v364_v45 = vpack.c.bf16 %v281_v44, %v280_v40 }
  0xdc   :  { %365 = vst [vmem:[#allocation4] sm:$0xff] %v364_v45  }
  0xdd   :  { %471 = shalt.err (!%p468_p4)
}
  0xde   :  { %s508_s17 = smov 64   ;;  %s509_s18 = smov 4   ;;  %vm183_vm2 = vcmask 25600  }
  0xdf   :  { %325 = dma.vmem_to_hbm [thread:$0]  %s320_s16, 256, %s653_s6, [#allocation5], %s508_s17, %s508_s17, %s509_s18  }
  0xe0   :  { %s510_s21 = smov [#allocation2]  }
  0xe1   :  { %s310_s22 = sshll.u32 %s510_s21, 4  ;;  %s311_s22 = int_to_ptr.vmem [resolvable:$true] %s310_s22 }
  0xe2   :  { %s480_s23 = scalar_lea.vmem %s311_s22, 32  ;;  %p485_p6 = scmp.lt.s32.totalorder %s311_s22, %s311_s22 }
  0xe3   :  { %p481_p5 = scmp.ne.s32.totalorder %s311_s22, %s480_s23  ;;  %p486_p7 = scmp.lt.s32.totalorder %s480_s23, %s480_s23 }
  0xe5   :  { %p487_p8 = por %p486_p7, %p485_p6 }
  0xe7   :  { %p488_p9 = pnand %p487_p8, %p481_p5 }
 0x18c   :  { %v179_v46 = vpop.f32.mrf.mxu1 }
 0x18d   :  { %184 = vst.msk [vmem:[#allocation2] sm:$0x3] %vm183_vm2, %v179_v46 }
 0x18e   :  { %v439_v47 = vpop.f32.mrf.mxu1 }
 0x18f   :  { %491 = shalt.err (!%p488_p9)
}
 0x190   :  { %313 = dma.vmem_to_hbm [thread:$0]  %s311_s22, 32, %s652_s5, [#allocation3]  }
 0x191   :  { %500 = dma.done.wait [#allocation3], 32  }
 0x192   :  { %501 = vsyncadd [#allocation3], 4294967264 }
 0x193   :  { %502 = dma.done.wait [#allocation5], 256  }
 0x194   :  { %503 = vsyncadd [#allocation5], 4294967040 }
 0x195   :  { %332 = vsyncpa [#allocation3], 1 }
 0x196   :  { %333 = vsyncpa [#allocation5], 1 }

</bundles_post_ra>
